<compile_context>
chip_gen: v5e
topology: v5e:2x2
jax: 0.10.0
libtpu: 0.0.40
codegen_flags: <defaults>
</compile_context>

<pallas_src>
import functools

import jax
import jax.numpy as jnp
from jax.experimental import pallas as pl
from jax.experimental.pallas import tpu as pltpu


def _combo_kernel(patches_ref, wc_ref, bc_ref, w1_ref, b1_ref, we_ref, be_ref,
                  wl_ref, bl_ref, out_ref, *, hw):
    """One batch tile: conv (im2col matmul) -> ReLU -> global-avg-pool -> MLP head."""
    tb, _, kc = patches_ref.shape            # (TB, H*W, 9*C)
    f = wc_ref.shape[1]

    # 3x3 conv (padding=1) as a single im2col matmul over the whole batch tile.
    # The reshape only merges leading dims (hw % 8 == 0 here), so it is layout-free.
    patches = patches_ref[...].reshape(tb * hw, kc)
    conv = jnp.dot(patches, wc_ref[...], preferred_element_type=jnp.float32)
    conv = jnp.maximum(conv + bc_ref[...], 0.0)                      # (TB*HW, F), ReLU

    # Global average pool over spatial positions (sublane reduce per batch element).
    pooled = jnp.sum(conv.reshape(tb, hw, f), axis=1) * (1.0 / hw)   # (TB, F)

    # cnn latent: Linear(F -> D) + ReLU, batched over the whole tile.
    h1 = jnp.dot(pooled, w1_ref[...], preferred_element_type=jnp.float32) + b1_ref[...]
    h1 = jnp.maximum(h1, 0.0)                                        # (TB, D)

    # drmodel latent z: Linear(D -> L).
    z = jnp.dot(h1, we_ref[...], preferred_element_type=jnp.float32) + be_ref[...]   # (TB, L)

    # drmodel output: sigmoid(Linear(L -> 1)).
    logit = jnp.dot(z, wl_ref[...], preferred_element_type=jnp.float32) + bl_ref[...]  # (TB, 1)

    # Single packed writeback: column 0 = ret, columns 1.. = z.
    out_ref[:, 0:1] = jax.nn.sigmoid(logit)
    out_ref[:, 1:] = z


def combo_model_forward(x_nchw, params, *, max_batch_tile=128):
    """Runs ComboModel.forward.  Returns (ret [B,1], z [B,L])."""
    wc, bc, w1, b1, we, be, wl, bl = params
    B, C, H, W = x_nchw.shape
    F = wc.shape[-1]
    D = w1.shape[-1]
    L = we.shape[-1]
    HW = H * W
    KC = 9 * C

    # ---- wrapper-side layout plumbing (plain XLA): NCHW -> NHWC, pad, im2col ----
    x_nhwc = jnp.transpose(x_nchw, (0, 2, 3, 1)).astype(jnp.float32)
    x_pad = jnp.pad(x_nhwc, ((0, 0), (1, 1), (1, 1), (0, 0)))
    cols = [x_pad[:, kh:kh + H, kw:kw + W, :] for kh in range(3) for kw in range(3)]
    patches = jnp.stack(cols, axis=3).reshape(B, HW, KC)     # (B, H*W, 9*C), (kh,kw,c) order
    wc9 = wc.reshape(KC, F)                                  # (3,3,C,F) -> (9*C, F), same order

    # ---- batch tiling: biggest tile that keeps the block VMEM-friendly & spec-legal ----
    TB = B if B <= max_batch_tile else max_batch_tile        # TB==B, or TB=128 (divisible by 8)
    n_tiles = -(-B // TB)
    B_pad = n_tiles * TB
    if B_pad != B:
        patches = jnp.pad(patches, ((0, B_pad - B), (0, 0), (0, 0)))

    kernel = functools.partial(_combo_kernel, hw=HW)
    const = lambda shape: pl.BlockSpec(shape, lambda b: (0,) * len(shape))

    packed = pl.pallas_call(
        kernel,
        out_shape=jax.ShapeDtypeStruct((B_pad, 1 + L), jnp.float32),
        grid_spec=pltpu.PrefetchScalarGridSpec(
            num_scalar_prefetch=0,
            grid=(n_tiles,),
            in_specs=[
                pl.BlockSpec((TB, HW, KC), lambda b: (b, 0, 0)),  # im2col patches per batch tile
                const((KC, F)),   # conv weight (9*C, F)
                const((1, F)),    # conv bias
                const((F, D)),    # cnn linear weight
                const((1, D)),    # cnn linear bias
                const((D, L)),    # drmodel encoder weight
                const((1, L)),    # drmodel encoder bias
                const((L, 1)),    # drmodel logit weight
                const((1, 1)),    # drmodel logit bias
            ],
            out_specs=pl.BlockSpec((TB, 1 + L), lambda b: (b, 0)),
        ),
        compiler_params=pltpu.CompilerParams(
            dimension_semantics=("parallel",),        # batch tiles are independent (v7x: 2 TCs)
            vmem_limit_bytes=32 * 1024 * 1024,        # explicit budget; 2x(TB*HW*9C*4B) << 32MiB
        ),
    )(patches, wc9, bc, w1, b1, we, be, wl, bl)

    ret = packed[:B, :1]
    z = packed[:B, 1:]
    return ret, z


def _reference_forward(x_nchw, params):
    """Plain-JAX reference for correctness checking."""
    wc, bc, w1, b1, we, be, wl, bl = params
    x = jnp.transpose(x_nchw, (0, 2, 3, 1)).astype(jnp.float32)   # NHWC
    y = jax.lax.conv_general_dilated(
        x, wc, window_strides=(1, 1), padding="SAME",
        dimension_numbers=("NHWC", "HWIO", "NHWC"))
    y = jnp.maximum(y + bc.reshape(1, 1, 1, -1), 0.0)
    pooled = jnp.mean(y, axis=(1, 2))                             # (B, F)
    h1 = jnp.maximum(pooled @ w1 + b1, 0.0)                       # (B, D)
    z = h1 @ we + be                                              # (B, L)
    logit = z @ wl + bl                                           # (B, 1)
    return jax.nn.sigmoid(logit), z


def _init_params(key, C, F, D, L):
    ks = jax.random.split(key, 8)
    wc = 0.1 * jax.random.normal(ks[0], (3, 3, C, F), jnp.float32)
    bc = 0.05 * jax.random.normal(ks[1], (1, F), jnp.float32)
    w1 = 0.1 * jax.random.normal(ks[2], (F, D), jnp.float32)
    b1 = 0.05 * jax.random.normal(ks[3], (1, D), jnp.float32)
    we = 0.1 * jax.random.normal(ks[4], (D, L), jnp.float32)
    be = 0.05 * jax.random.normal(ks[5], (1, L), jnp.float32)
    wl = 0.1 * jax.random.normal(ks[6], (L, 1), jnp.float32)
    bl = 0.05 * jax.random.normal(ks[7], (1, 1), jnp.float32)
    return (wc, bc, w1, b1, we, be, wl, bl)


if __name__ == "__main__":
    key = jax.random.PRNGKey(0)
    kx, kp = jax.random.split(key)

    B, C, H, W = 2, 4, 16, 16        # input (NCHW like PyTorch)
    F, D, L = 8, 32, 8               # conv filters, cnn latent, drmodel latent

    x = jax.random.normal(kx, (B, C, H, W), jnp.float32)
    params = _init_params(kp, C, F, D, L)

    ret, z = combo_model_forward(x, params)
    ret = jax.block_until_ready(ret)
    z = jax.block_until_ready(z)

    ret_ref, z_ref = _reference_forward(x, params)
    assert jnp.allclose(ret, ret_ref, atol=1e-4, rtol=1e-4), "ret mismatch"
    assert jnp.allclose(z, z_ref, atol=1e-4, rtol=1e-4), "z mismatch"

    # TODO(synk): ComboModel's concrete cnn/drmodel are constructor args in PyTorch; the
    # Conv->ReLU->GAP->Linear backbone and Linear->sigmoid head here are representative stand-ins.

    print("KERNEL_OK")
</pallas_src>

<mosaic_0001>
module attributes {stable_mosaic.version = 11 : i64} {
  func.func @_combo_kernel(%arg0: i32, %arg1: memref<2x256x36xf32, #tpu.memory_space<vmem>>, %arg2: memref<36x8xf32, #tpu.memory_space<vmem>>, %arg3: memref<1x8xf32, #tpu.memory_space<vmem>>, %arg4: memref<8x32xf32, #tpu.memory_space<vmem>>, %arg5: memref<1x32xf32, #tpu.memory_space<vmem>>, %arg6: memref<32x8xf32, #tpu.memory_space<vmem>>, %arg7: memref<1x8xf32, #tpu.memory_space<vmem>>, %arg8: memref<8x1xf32, #tpu.memory_space<vmem>>, %arg9: memref<1x1xf32, #tpu.memory_space<vmem>>, %arg10: memref<2x9xf32, #tpu.memory_space<vmem>>) attributes {dimension_semantics = [#tpu.dimension_semantics<parallel>], iteration_bounds = array<i64: 1>, scalar_prefetch = 0 : i64, scratch_operands = 0 : i64, tpu.core_type = #tpu.core_type<tc>, window_params = [{transform_indices = @transform_0, window_bounds = array<i64: 2, 256, 36>}, {pipeline_mode = #tpu.pipeline_mode<synchronous>, transform_indices = @transform_1, window_bounds = array<i64: 36, 8>}, {pipeline_mode = #tpu.pipeline_mode<synchronous>, transform_indices = @transform_2, window_bounds = array<i64: 1, 8>}, {pipeline_mode = #tpu.pipeline_mode<synchronous>, transform_indices = @transform_3, window_bounds = array<i64: 8, 32>}, {pipeline_mode = #tpu.pipeline_mode<synchronous>, transform_indices = @transform_4, window_bounds = array<i64: 1, 32>}, {pipeline_mode = #tpu.pipeline_mode<synchronous>, transform_indices = @transform_5, window_bounds = array<i64: 32, 8>}, {pipeline_mode = #tpu.pipeline_mode<synchronous>, transform_indices = @transform_6, window_bounds = array<i64: 1, 8>}, {pipeline_mode = #tpu.pipeline_mode<synchronous>, transform_indices = @transform_7, window_bounds = array<i64: 8, 1>}, {pipeline_mode = #tpu.pipeline_mode<synchronous>, transform_indices = @transform_8, window_bounds = array<i64: 1, 1>}, {transform_indices = @transform_9, window_bounds = array<i64: 2, 9>}]} {
    %c0 = arith.constant 0 : index
    %c0_0 = arith.constant 0 : index
    %c0_1 = arith.constant 0 : index
    %0 = vector.load %arg1[%c0, %c0_0, %c0_1] : memref<2x256x36xf32, #tpu.memory_space<vmem>>, vector<2x256x36xf32>
    %1 = vector.shape_cast %0 : vector<2x256x36xf32> to vector<512x36xf32>
    %c0_2 = arith.constant 0 : index
    %c0_3 = arith.constant 0 : index
    %2 = vector.load %arg2[%c0_2, %c0_3] : memref<36x8xf32, #tpu.memory_space<vmem>>, vector<36x8xf32>
    %cst = arith.constant dense<0.000000e+00> : vector<512x8xf32>
    %3 = tpu.matmul %1, %2, %cst {dimension_numbers = #tpu.dot_dimension_numbers<[1], [0], [0], [1], [0, 0, 1, 1], [], []>} : vector<512x36xf32>, vector<36x8xf32>, vector<512x8xf32> -> vector<512x8xf32>
    %c0_4 = arith.constant 0 : index
    %c0_5 = arith.constant 0 : index
    %4 = vector.load %arg3[%c0_4, %c0_5] : memref<1x8xf32, #tpu.memory_space<vmem>>, vector<1x8xf32>
    %5 = vector.broadcast %4 : vector<1x8xf32> to vector<512x8xf32>
    %6 = arith.addf %3, %5 : vector<512x8xf32>
    %cst_6 = arith.constant 0.000000e+00 : f32
    %7 = vector.broadcast %cst_6 : f32 to vector<512x8xf32>
    %8 = arith.maximumf %6, %7 : vector<512x8xf32>
    %9 = vector.shape_cast %8 : vector<512x8xf32> to vector<2x256x8xf32>
    %cst_7 = arith.constant dense<0.000000e+00> : vector<2x8xf32>
    %10 = vector.multi_reduction <add>, %9, %cst_7 [1] : vector<2x256x8xf32> to vector<2x8xf32>
    %cst_8 = arith.constant 3.906250e-03 : f32
    %11 = vector.broadcast %cst_8 : f32 to vector<2x8xf32>
    %12 = arith.mulf %10, %11 : vector<2x8xf32>
    %c0_9 = arith.constant 0 : index
    %c0_10 = arith.constant 0 : index
    %13 = vector.load %arg4[%c0_9, %c0_10] : memref<8x32xf32, #tpu.memory_space<vmem>>, vector<8x32xf32>
    %cst_11 = arith.constant dense<0.000000e+00> : vector<2x32xf32>
    %14 = tpu.matmul %12, %13, %cst_11 {dimension_numbers = #tpu.dot_dimension_numbers<[1], [0], [0], [1], [0, 0, 1, 1], [], []>} : vector<2x8xf32>, vector<8x32xf32>, vector<2x32xf32> -> vector<2x32xf32>
    %c0_12 = arith.constant 0 : index
    %c0_13 = arith.constant 0 : index
    %15 = vector.load %arg5[%c0_12, %c0_13] : memref<1x32xf32, #tpu.memory_space<vmem>>, vector<1x32xf32>
    %16 = vector.broadcast %15 : vector<1x32xf32> to vector<2x32xf32>
    %17 = arith.addf %14, %16 : vector<2x32xf32>
    %cst_14 = arith.constant 0.000000e+00 : f32
    %18 = vector.broadcast %cst_14 : f32 to vector<2x32xf32>
    %19 = arith.maximumf %17, %18 : vector<2x32xf32>
    %c0_15 = arith.constant 0 : index
    %c0_16 = arith.constant 0 : index
    %20 = vector.load %arg6[%c0_15, %c0_16] : memref<32x8xf32, #tpu.memory_space<vmem>>, vector<32x8xf32>
    %cst_17 = arith.constant dense<0.000000e+00> : vector<2x8xf32>
    %21 = tpu.matmul %19, %20, %cst_17 {dimension_numbers = #tpu.dot_dimension_numbers<[1], [0], [0], [1], [0, 0, 1, 1], [], []>} : vector<2x32xf32>, vector<32x8xf32>, vector<2x8xf32> -> vector<2x8xf32>
    %c0_18 = arith.constant 0 : index
    %c0_19 = arith.constant 0 : index
    %22 = vector.load %arg7[%c0_18, %c0_19] : memref<1x8xf32, #tpu.memory_space<vmem>>, vector<1x8xf32>
    %23 = vector.broadcast %22 : vector<1x8xf32> to vector<2x8xf32>
    %24 = arith.addf %21, %23 : vector<2x8xf32>
    %c0_20 = arith.constant 0 : index
    %c0_21 = arith.constant 0 : index
    %25 = vector.load %arg8[%c0_20, %c0_21] : memref<8x1xf32, #tpu.memory_space<vmem>>, vector<8x1xf32>
    %cst_22 = arith.constant dense<0.000000e+00> : vector<2x1xf32>
    %26 = tpu.matmul %24, %25, %cst_22 {dimension_numbers = #tpu.dot_dimension_numbers<[1], [0], [0], [1], [0, 0, 1, 1], [], []>} : vector<2x8xf32>, vector<8x1xf32>, vector<2x1xf32> -> vector<2x1xf32>
    %c0_23 = arith.constant 0 : index
    %c0_24 = arith.constant 0 : index
    %27 = vector.load %arg9[%c0_23, %c0_24] : memref<1x1xf32, #tpu.memory_space<vmem>>, vector<1x1xf32>
    %28 = vector.broadcast %27 : vector<1x1xf32> to vector<2x1xf32>
    %29 = arith.addf %26, %28 : vector<2x1xf32>
    %30 = arith.negf %29 : vector<2x1xf32>
    %31 = math.exp %30 : vector<2x1xf32>
    %cst_25 = arith.constant 1.000000e+00 : f32
    %32 = vector.broadcast %cst_25 : f32 to vector<2x1xf32>
    %33 = arith.addf %32, %31 : vector<2x1xf32>
    %34 = arith.divf %32, %33 : vector<2x1xf32>
    %c0_26 = arith.constant 0 : index
    %c0_27 = arith.constant 0 : index
    %35 = vector.load %arg10[%c0_26, %c0_27] : memref<2x9xf32, #tpu.memory_space<vmem>>, vector<2x1xf32>
    tpu.vector_store %arg10[%c0_26, %c0_27], %34 {strides = array<i32>} : memref<2x9xf32, #tpu.memory_space<vmem>>, vector<2x1xf32>,
    %c0_28 = arith.constant 0 : index
    %c1 = arith.constant 1 : index
    %36 = vector.load %arg10[%c0_28, %c1] : memref<2x9xf32, #tpu.memory_space<vmem>>, vector<2x8xf32>
    tpu.vector_store %arg10[%c0_28, %c1], %24 {strides = array<i32>} : memref<2x9xf32, #tpu.memory_space<vmem>>, vector<2x8xf32>,
    return
  }
  func.func @transform_0(%arg0: i32) -> (i32, i32, i32) {
    %c0_i32 = arith.constant 0 : i32
    %c0_i32_0 = arith.constant 0 : i32
    %c0_i32_1 = arith.constant 0 : i32
    return %arg0, %c0_i32, %c0_i32_0 : i32, i32, i32
  }
  func.func @transform_1(%arg0: i32) -> (i32, i32) {
    %c0_i32 = arith.constant 0 : i32
    %c0_i32_0 = arith.constant 0 : i32
    %c0_i32_1 = arith.constant 0 : i32
    return %c0_i32, %c0_i32_0 : i32, i32
  }
  func.func @transform_2(%arg0: i32) -> (i32, i32) {
    %c0_i32 = arith.constant 0 : i32
    %c0_i32_0 = arith.constant 0 : i32
    %c0_i32_1 = arith.constant 0 : i32
    return %c0_i32, %c0_i32_0 : i32, i32
  }
  func.func @transform_3(%arg0: i32) -> (i32, i32) {
    %c0_i32 = arith.constant 0 : i32
    %c0_i32_0 = arith.constant 0 : i32
    %c0_i32_1 = arith.constant 0 : i32
    return %c0_i32, %c0_i32_0 : i32, i32
  }
  func.func @transform_4(%arg0: i32) -> (i32, i32) {
    %c0_i32 = arith.constant 0 : i32
    %c0_i32_0 = arith.constant 0 : i32
    %c0_i32_1 = arith.constant 0 : i32
    return %c0_i32, %c0_i32_0 : i32, i32
  }
  func.func @transform_5(%arg0: i32) -> (i32, i32) {
    %c0_i32 = arith.constant 0 : i32
    %c0_i32_0 = arith.constant 0 : i32
    %c0_i32_1 = arith.constant 0 : i32
    return %c0_i32, %c0_i32_0 : i32, i32
  }
  func.func @transform_6(%arg0: i32) -> (i32, i32) {
    %c0_i32 = arith.constant 0 : i32
    %c0_i32_0 = arith.constant 0 : i32
    %c0_i32_1 = arith.constant 0 : i32
    return %c0_i32, %c0_i32_0 : i32, i32
  }
  func.func @transform_7(%arg0: i32) -> (i32, i32) {
    %c0_i32 = arith.constant 0 : i32
    %c0_i32_0 = arith.constant 0 : i32
    %c0_i32_1 = arith.constant 0 : i32
    return %c0_i32, %c0_i32_0 : i32, i32
  }
  func.func @transform_8(%arg0: i32) -> (i32, i32) {
    %c0_i32 = arith.constant 0 : i32
    %c0_i32_0 = arith.constant 0 : i32
    %c0_i32_1 = arith.constant 0 : i32
    return %c0_i32, %c0_i32_0 : i32, i32
  }
  func.func @transform_9(%arg0: i32) -> (i32, i32) {
    %c0_i32 = arith.constant 0 : i32
    %c0_i32_0 = arith.constant 0 : i32
    return %arg0, %c0_i32 : i32, i32
  }
}

</mosaic_0001>

<bundles_post_ra>
// kernel: tpu_custom_call.1
= control target key start
LH: loop header
LB: loop body
LE: loop exit
PB: predicated region body
PF: predicated region fallthrough
CT: control target
= control target key end

     0   :  { %s1587_s0 = inlined_call_operand.vmem [shape: f32[2,256,36], index: 0, kind: input, shape index: {}]   ;;  %s1588_s1 = inlined_call_operand.vmem [shape: f32[36,8], index: 1, kind: input, shape index: {}]   ;;  %s1589_s2 = inlined_call_operand.vmem [shape: f32[1,8], index: 2, kind: input, shape index: {}]   ;;  %s1590_s3 = inlined_call_operand.vmem [shape: f32[8,32], index: 3, kind: input, shape index: {}]   ;;  %s1591_s4 = inlined_call_operand.vmem [shape: f32[1,32], index: 4, kind: input, shape index: {}]   ;;  %s1592_s5 = inlined_call_operand.vmem [shape: f32[32,8], index: 5, kind: input, shape index: {}]   ;;  %s1593_s6 = inlined_call_operand.vmem [shape: f32[1,8], index: 6, kind: input, shape index: {}]   ;;  %s1594_s7 = inlined_call_operand.vmem [shape: f32[8,1], index: 7, kind: input, shape index: {}]   ;;  %s1595_s8 = inlined_call_operand.<no memory space> [shape: f32[1,1], index: 8, kind: input, shape index: {}]   ;;  %s1596_s9 = inlined_call_operand.hbm [shape: f32[2,9], index: 9, kind: output, shape index: {}]  }
   0x1   :  { %v14_v0 = vstv %s1595_s8 }
   0x2   :  { %15 = vst [vmem:[#allocation2] sm:$0x1] %v14_v0 }
   0x3   :  { %v103_v1 = vld [vmem:[%s1588_s1 + $0x20] sm:$0xf]  ;;  %vm301_vm0 = vcmask 1043456   ;;  %v102_v2 = vld [vmem:[%s1588_s1 + $0x18] sm:$0xff]  ;;  %v101_v3 = vld [vmem:[%s1588_s1 + $0x10] sm:$0xff] }
   0x4   :  { %853 = vmatpush.msk.msra.mxu0 %vm301_vm0, %v103_v1  ;;  %922 = vmatpush.msk.msra.mxu1 %vm301_vm0, %v103_v1  ;;  %v100_v4 = vld [vmem:[%s1588_s1 + $0x8] sm:$0xff]  ;;  %v99_v5 = vld [vmem:[%s1588_s1] sm:$0xff] }
   0x5   :  { %923 = vmatpush.msk.msra.mxu2 %vm301_vm0, %v103_v1  ;;  %924 = vmatpush.msk.msra.mxu3 %vm301_vm0, %v103_v1 }
   0x6   :  { %317 = vmatpush.msra.mxu0 %v102_v2  ;;  %925 = vmatpush.msra.mxu1 %v102_v2 }
   0x7   :  { %926 = vmatpush.msra.mxu2 %v102_v2  ;;  %927 = vmatpush.msra.mxu3 %v102_v2 }
   0x8   :  { %318 = vmatpush.msra.mxu0 %v101_v3  ;;  %928 = vmatpush.msra.mxu1 %v101_v3 }
   0x9   :  { %929 = vmatpush.msra.mxu2 %v101_v3  ;;  %930 = vmatpush.msra.mxu3 %v101_v3 }
   0xa   :  { %16 = vsyncpa [#allocation4], 0  ;;  %319 = vmatpush.msra.mxu0 %v100_v4  ;;  %931 = vmatpush.msra.mxu1 %v100_v4  ;;  %v35_v6 = vld [vmem:[%s1587_s0] sm:$0xff]  ;;  %vm108_vm1 = vcmask 293888   ;;  %v52_v7 = vld [vmem:[%s1587_s0 + $0x88] sm:$0xff]  ;;  %vm578_vm2 = vcmask 64512  }
   0xb   :  { %932 = vmatpush.msra.mxu2 %v100_v4  ;;  %933 = vmatpush.msra.mxu3 %v100_v4  ;;  %v68_v8 = vld [vmem:[%s1587_s0 + $0x108] sm:$0xff]  ;;  %v53_v10 = vld [vmem:[%s1587_s0 + $0x90] sm:$0xff]  ;;  %v54_v13 = vld [vmem:[%s1587_s0 + $0x98] sm:$0xff]  ;;  %vm726_vm3 = vcmask 1041409   ;;  %vm759_vm4 = vcmask 261120   ;;  %s973_s24 = smov 1  }
   0xc   :  { %320 = vmatpush.msra.mxu0 %v99_v5  ;;  %934 = vmatpush.msra.mxu1 %v99_v5  ;;  %v36_v9 = vld [vmem:[%s1587_s0 + $0x8] sm:$0xff]  ;;  %v69_v11 = vld [vmem:[%s1587_s0 + $0x110] sm:$0xff]  ;;  %v70_v14 = vld [vmem:[%s1587_s0 + $0x118] sm:$0xff]  ;;  %s844_s25 = sshll.u32 %s1596_s9, 4  ;;  %vm830_vm8 = vcmask 1024   ;;  %vm835_vm10 = vcmask 66568   ;;  %s845_s25 = int_to_ptr.hbm [resolvable:$true] %s844_s25 }
   0xd   :  { %854 = vmatmul.msk.f32.vlgmr.msra.gmra.mxu0 %vm108_vm1, %v35_v6  ;;  %871 = vmatmul.msk.f32.vlgmr.msra.gmra.mxu1 %vm108_vm1, %v52_v7  ;;  %v37_v12 = vld [vmem:[%s1587_s0 + $0x10] sm:$0xff]  ;;  %v83_v15 = vld [vmem:[%s1587_s0 + $0x180] sm:$0xff]  ;;  %v38_v16 = vld [vmem:[%s1587_s0 + $0x18] sm:$0xff] }
   0xe   :  { %935 = vmatpush.msra.mxu2 %v99_v5  ;;  %936 = vmatpush.msra.mxu3 %v99_v5  ;;  %v55_v17 = vld [vmem:[%s1587_s0 + $0xa0] sm:$0xff]  ;;  %v84_v19 = vld [vmem:[%s1587_s0 + $0x188] sm:$0xff]  ;;  %v85_v23 = vld [vmem:[%s1587_s0 + $0x190] sm:$0xff] }
   0xf   :  { %887 = vmatmul.msk.f32.vlgmr.msra.gmra.mxu2 %vm108_vm1, %v68_v8  ;;  %902 = vmatmul.msk.f32.vlgmr.msra.gmra.mxu3 %vm108_vm1, %v83_v15  ;;  %v71_v18 = vld [vmem:[%s1587_s0 + $0x120] sm:$0xff]  ;;  %v56_v21 = vld [vmem:[%s1587_s0 + $0xa8] sm:$0xff]  ;;  %v57_v25 = vld [vmem:[%s1587_s0 + $0xb0] sm:$0xff] }
  0x10   :  { %v39_v20 = vld [vmem:[%s1587_s0 + $0x20] sm:$0xff]  ;;  %v72_v22 = vld [vmem:[%s1587_s0 + $0x128] sm:$0xff]  ;;  %v73_v26 = vld [vmem:[%s1587_s0 + $0x130] sm:$0xff] }
  0x11   :  { %v40_v24 = vld [vmem:[%s1587_s0 + $0x28] sm:$0xff]  ;;  %v86_v27 = vld [vmem:[%s1587_s0 + $0x198] sm:$0xff]  ;;  %v41_v28 = vld [vmem:[%s1587_s0 + $0x30] sm:$0xff] }
  0x12   :  { %v58_v29 = vld [vmem:[%s1587_s0 + $0xb8] sm:$0xff]  ;;  %v87_v31 = vld [vmem:[%s1587_s0 + $0x1a0] sm:$0xff]  ;;  %v88_v35 = vld [vmem:[%s1587_s0 + $0x1a8] sm:$0xff] }
  0x13   :  { %v74_v30 = vld [vmem:[%s1587_s0 + $0x138] sm:$0xff]  ;;  %v59_v33 = vld [vmem:[%s1587_s0 + $0xc0] sm:$0xff]  ;;  %v60_v37 = vld [vmem:[%s1587_s0 + $0xc8] sm:$0xff] }
  0x14   :  { %v42_v32 = vld [vmem:[%s1587_s0 + $0x38] sm:$0xff]  ;;  %v75_v34 = vld [vmem:[%s1587_s0 + $0x140] sm:$0xff]  ;;  %v76_v38 = vld [vmem:[%s1587_s0 + $0x148] sm:$0xff] }
  0x15   :  { %855 = vmatmul.msk.f32.gmra.mxu0 %vm108_vm1, %v36_v9  ;;  %872 = vmatmul.msk.f32.gmra.mxu1 %vm108_vm1, %v53_v10  ;;  %v43_v36 = vld [vmem:[%s1587_s0 + $0x40] sm:$0xff]  ;;  %v89_v39 = vld [vmem:[%s1587_s0 + $0x1b0] sm:$0xff]  ;;  %v44_v40 = vld [vmem:[%s1587_s0 + $0x48] sm:$0xff] }
  0x16   :  { %v61_v41 = vld [vmem:[%s1587_s0 + $0xd0] sm:$0xff]  ;;  %v90_v43 = vld [vmem:[%s1587_s0 + $0x1b8] sm:$0xff]  ;;  %v91_v47 = vld [vmem:[%s1587_s0 + $0x1c0] sm:$0xff] }
  0x17   :  { %888 = vmatmul.msk.f32.gmra.mxu2 %vm108_vm1, %v69_v11  ;;  %903 = vmatmul.msk.f32.gmra.mxu3 %vm108_vm1, %v84_v19  ;;  %v77_v42 = vld [vmem:[%s1587_s0 + $0x150] sm:$0xff]  ;;  %v62_v45 = vld [vmem:[%s1587_s0 + $0xd8] sm:$0xff]  ;;  %v63_v49 = vld [vmem:[%s1587_s0 + $0xe0] sm:$0xff] }
  0x18   :  { %v45_v44 = vld [vmem:[%s1587_s0 + $0x50] sm:$0xff]  ;;  %v78_v46 = vld [vmem:[%s1587_s0 + $0x158] sm:$0xff]  ;;  %v79_v50 = vld [vmem:[%s1587_s0 + $0x160] sm:$0xff] }
  0x19   :  { %v46_v48 = vld [vmem:[%s1587_s0 + $0x58] sm:$0xff]  ;;  %v47_v51 = vld [vmem:[%s1587_s0 + $0x60] sm:$0xff]  ;;  %v64_v52 = vld [vmem:[%s1587_s0 + $0xe8] sm:$0xff] }
  0x1a   :  { %v92_v53 = vld [vmem:[%s1587_s0 + $0x1c8] sm:$0xff]  ;;  %v65_v56 = vld [vmem:[%s1587_s0 + $0xf0] sm:$0xff]  ;;  %v66_v60 = vld [vmem:[%s1587_s0 + $0xf8] sm:$0xff] }
  0x1b   :  { %v80_v54 = vld [vmem:[%s1587_s0 + $0x168] sm:$0xff]  ;;  %v93_v57 = vld [vmem:[%s1587_s0 + $0x1d0] sm:$0xff]  ;;  %v94_v61 = vld [vmem:[%s1587_s0 + $0x1d8] sm:$0xff] }
  0x1c   :  { %v48_v55 = vld [vmem:[%s1587_s0 + $0x68] sm:$0xff]  ;;  %v81_v58 = vld [vmem:[%s1587_s0 + $0x170] sm:$0xff]  ;;  %v82_v62 = vld [vmem:[%s1587_s0 + $0x178] sm:$0xff] }
  0x1d   :  { %856 = vmatmul.msk.f32.gmra.mxu0 %vm108_vm1, %v37_v12  ;;  %873 = vmatmul.msk.f32.gmra.mxu1 %vm108_vm1, %v54_v13  ;;  %v49_v59 = vld [vmem:[%s1587_s0 + $0x70] sm:$0xff]  ;;  %v50_v63 = vld [vmem:[%s1587_s0 + $0x78] sm:$0xff]  ;;  %v67_v0 = vld [vmem:[%s1587_s0 + $0x100] sm:$0xff] }
  0x1e   :  { %v95_v1 = vld [vmem:[%s1587_s0 + $0x1e0] sm:$0xff]  ;;  %v96_v5 = vld [vmem:[%s1587_s0 + $0x1e8] sm:$0xff]  ;;  %v97_v11 = vld [vmem:[%s1587_s0 + $0x1f0] sm:$0xff] }
  0x1f   :  { %889 = vmatmul.msk.f32.gmra.mxu2 %vm108_vm1, %v70_v14  ;;  %904 = vmatmul.msk.f32.gmra.mxu3 %vm108_vm1, %v85_v23  ;;  %v51_v4 = vld [vmem:[%s1587_s0 + $0x80] sm:$0xff] }
  0x20   :  { %v1294_v6 = vld [vmem:[%s1589_s2] ss:$0 sm:$0xff] }
  0x25   :  { %857 = vmatmul.msk.f32.gmra.mxu0 %vm108_vm1, %v38_v16  ;;  %874 = vmatmul.msk.f32.gmra.mxu1 %vm108_vm1, %v55_v17 }
  0x27   :  { %890 = vmatmul.msk.f32.gmra.mxu2 %vm108_vm1, %v71_v18  ;;  %905 = vmatmul.msk.f32.gmra.mxu3 %vm108_vm1, %v86_v27 }
  0x2d   :  { %858 = vmatmul.msk.f32.gmra.mxu0 %vm108_vm1, %v39_v20  ;;  %875 = vmatmul.msk.f32.gmra.mxu1 %vm108_vm1, %v56_v21  ;;  %v98_v20 = vld [vmem:[%s1587_s0 + $0x1f8] sm:$0xff] }
  0x2f   :  { %891 = vmatmul.msk.f32.gmra.mxu2 %vm108_vm1, %v72_v22  ;;  %906 = vmatmul.msk.f32.gmra.mxu3 %vm108_vm1, %v87_v31 }
  0x35   :  { %859 = vmatmul.msk.f32.gmra.mxu0 %vm108_vm1, %v40_v24  ;;  %876 = vmatmul.msk.f32.gmra.mxu1 %vm108_vm1, %v57_v25 }
  0x37   :  { %892 = vmatmul.msk.f32.gmra.mxu2 %vm108_vm1, %v73_v26  ;;  %907 = vmatmul.msk.f32.gmra.mxu3 %vm108_vm1, %v88_v35 }
  0x3d   :  { %860 = vmatmul.msk.f32.gmra.mxu0 %vm108_vm1, %v41_v28  ;;  %877 = vmatmul.msk.f32.gmra.mxu1 %vm108_vm1, %v58_v29 }
  0x3f   :  { %893 = vmatmul.msk.f32.gmra.mxu2 %vm108_vm1, %v74_v30  ;;  %908 = vmatmul.msk.f32.gmra.mxu3 %vm108_vm1, %v89_v39 }
  0x45   :  { %861 = vmatmul.msk.f32.gmra.mxu0 %vm108_vm1, %v42_v32  ;;  %878 = vmatmul.msk.f32.gmra.mxu1 %vm108_vm1, %v59_v33 }
  0x47   :  { %894 = vmatmul.msk.f32.gmra.mxu2 %vm108_vm1, %v75_v34  ;;  %909 = vmatmul.msk.f32.gmra.mxu3 %vm108_vm1, %v90_v43 }
  0x4d   :  { %862 = vmatmul.msk.f32.gmra.mxu0 %vm108_vm1, %v43_v36  ;;  %879 = vmatmul.msk.f32.gmra.mxu1 %vm108_vm1, %v60_v37 }
  0x4f   :  { %895 = vmatmul.msk.f32.gmra.mxu2 %vm108_vm1, %v76_v38  ;;  %910 = vmatmul.msk.f32.gmra.mxu3 %vm108_vm1, %v91_v47 }
  0x55   :  { %863 = vmatmul.msk.f32.gmra.mxu0 %vm108_vm1, %v44_v40  ;;  %880 = vmatmul.msk.f32.gmra.mxu1 %vm108_vm1, %v61_v41 }
  0x57   :  { %896 = vmatmul.msk.f32.gmra.mxu2 %vm108_vm1, %v77_v42  ;;  %911 = vmatmul.msk.f32.gmra.mxu3 %vm108_vm1, %v92_v53 }
  0x5d   :  { %864 = vmatmul.msk.f32.gmra.mxu0 %vm108_vm1, %v45_v44  ;;  %881 = vmatmul.msk.f32.gmra.mxu1 %vm108_vm1, %v62_v45 }
  0x5f   :  { %897 = vmatmul.msk.f32.gmra.mxu2 %vm108_vm1, %v78_v46  ;;  %912 = vmatmul.msk.f32.gmra.mxu3 %vm108_vm1, %v93_v57 }
  0x65   :  { %865 = vmatmul.msk.f32.gmra.mxu0 %vm108_vm1, %v46_v48  ;;  %882 = vmatmul.msk.f32.gmra.mxu1 %vm108_vm1, %v63_v49 }
  0x67   :  { %898 = vmatmul.msk.f32.gmra.mxu2 %vm108_vm1, %v79_v50  ;;  %913 = vmatmul.msk.f32.gmra.mxu3 %vm108_vm1, %v94_v61  ;;  %v719_v50 = vld [vmem:[%s1590_s3] sm:$0xff] }
  0x68   :  { %745 = vmatpush.msrb.mxu1 %v719_v50 }
  0x6d   :  { %866 = vmatmul.msk.f32.gmra.mxu0 %vm108_vm1, %v47_v51  ;;  %883 = vmatmul.msk.f32.gmra.mxu1 %vm108_vm1, %v64_v52 }
  0x6f   :  { %899 = vmatmul.msk.f32.gmra.mxu2 %vm108_vm1, %v80_v54  ;;  %914 = vmatmul.msk.f32.gmra.mxu3 %vm108_vm1, %v95_v1 }
  0x75   :  { %867 = vmatmul.msk.f32.gmra.mxu0 %vm108_vm1, %v48_v55  ;;  %884 = vmatmul.msk.f32.gmra.mxu1 %vm108_vm1, %v65_v56 }
  0x77   :  { %900 = vmatmul.msk.f32.gmra.mxu2 %vm108_vm1, %v81_v58  ;;  %915 = vmatmul.msk.f32.gmra.mxu3 %vm108_vm1, %v96_v5 }
  0x7d   :  { %868 = vmatmul.msk.f32.gmra.mxu0 %vm108_vm1, %v49_v59  ;;  %885 = vmatmul.msk.f32.gmra.mxu1 %vm108_vm1, %v66_v60 }
  0x7f   :  { %901 = vmatmul.msk.f32.gmra.mxu2 %vm108_vm1, %v82_v62  ;;  %916 = vmatmul.msk.f32.gmra.mxu3 %vm108_vm1, %v97_v11 }
  0x85   :  { %869 = vmatmul.msk.f32.gmra.mxu0 %vm108_vm1, %v50_v63  ;;  %886 = vmatmul.msk.f32.gmra.mxu1 %vm108_vm1, %v67_v0 }
  0x87   :  { %917 = vmatmul.msk.f32.gmra.mxu3 %vm108_vm1, %v98_v20 }
  0x8a   :  { %v322_v2 = vpop.f32.mrf.mxu0  ;;  %v1283_v3 = vpop.f32.mrf.mxu1 }
  0x8b   :  { %v323_v7 = vadd.f32 %v1294_v6, %v322_v2 }
  0x8d   :  { %870 = vmatmul.msk.f32.gmra.mxu0 %vm108_vm1, %v51_v4  ;;  %v514_v8 = vmax.f32 %v323_v7, 0.0 }
  0x8f   :  { %v579_v14 = vsel %vm578_vm2, %v514_v8, 0.0 }
  0x92   :  { %v325_v9 = vpop.f32.mrf.mxu0  ;;  %v1299_v10 = vpop.f32.mrf.mxu1 }
  0x93   :  { %v326_v12 = vadd.f32 %v1294_v6, %v325_v9  ;;  %v1305_v13 = vpop.f32.mrf.mxu2  ;;  %v1325_v31 = vpop.f32.mrf.mxu3 }
  0x95   :  { %v515_v15 = vmax.f32 %v326_v12, 0.0 }
  0x97   :  { %v580_v16 = vsel %vm578_vm2, %v515_v15, 0.0 }
  0x98   :  { %v581_v17 = vadd.f32 %v580_v16, %v579_v14 }
  0x9a   :  { %v328_v18 = vpop.f32.mrf.mxu0  ;;  %v1310_v19 = vpop.f32.mrf.mxu1 }
  0x9b   :  { %v329_v21 = vadd.f32 %v1294_v6, %v328_v18  ;;  %v1316_v22 = vpop.f32.mrf.mxu2  ;;  %v1333_v39 = vpop.f32.mrf.mxu3 }
  0x9d   :  { %v516_v23 = vmax.f32 %v329_v21, 0.0 }
  0x9f   :  { %v582_v24 = vsel %vm578_vm2, %v516_v23, 0.0 }
  0xa0   :  { %v583_v25 = vadd.f32 %v582_v24, %v581_v17 }
  0xa2   :  { %v331_v26 = vpop.f32.mrf.mxu0  ;;  %v1320_v27 = vpop.f32.mrf.mxu1 }
  0xa3   :  { %v332_v28 = vadd.f32 %v1294_v6, %v331_v26  ;;  %v1323_v29 = vpop.f32.mrf.mxu2  ;;  %v1341_v47 = vpop.f32.mrf.mxu3 }
  0xa5   :  { %v517_v30 = vmax.f32 %v332_v28, 0.0 }
  0xa7   :  { %v584_v32 = vsel %vm578_vm2, %v517_v30, 0.0 }
  0xa8   :  { %v585_v33 = vadd.f32 %v584_v32, %v583_v25 }
  0xaa   :  { %v334_v34 = vpop.f32.mrf.mxu0  ;;  %v1328_v35 = vpop.f32.mrf.mxu1 }
  0xab   :  { %v335_v36 = vadd.f32 %v1294_v6, %v334_v34  ;;  %v1331_v37 = vpop.f32.mrf.mxu2  ;;  %v1351_v54 = vpop.f32.mrf.mxu3 }
  0xad   :  { %v518_v38 = vmax.f32 %v335_v36, 0.0 }
  0xaf   :  { %v586_v40 = vsel %vm578_vm2, %v518_v38, 0.0 }
  0xb0   :  { %v587_v41 = vadd.f32 %v586_v40, %v585_v33 }
  0xb2   :  { %v337_v42 = vpop.f32.mrf.mxu0  ;;  %v1336_v43 = vpop.f32.mrf.mxu1 }
  0xb3   :  { %v338_v44 = vadd.f32 %v1294_v6, %v337_v42  ;;  %v1339_v45 = vpop.f32.mrf.mxu2  ;;  %v1357_v58 = vpop.f32.mrf.mxu3 }
  0xb5   :  { %v519_v46 = vmax.f32 %v338_v44, 0.0 }
  0xb7   :  { %v588_v48 = vsel %vm578_vm2, %v519_v46, 0.0 }
  0xb8   :  { %v589_v49 = vadd.f32 %v588_v48, %v587_v41 }
  0xba   :  { %v340_v51 = vpop.f32.mrf.mxu0  ;;  %v1347_v52 = vpop.f32.mrf.mxu1 }
  0xbb   :  { %v1349_v53 = vpop.f32.mrf.mxu2  ;;  %v1363_v62 = vpop.f32.mrf.mxu3  ;;  %v341_v17 = vadd.f32 %v1294_v6, %v340_v51  ;;  %v422_v51 = vadd.f32 %v1294_v6, %v1305_v13  ;;  %v428_v13 = vadd.f32 %v1294_v6, %v1323_v29  ;;  %v431_v29 = vadd.f32 %v1294_v6, %v1331_v37 }
  0xbd   :  { %v520_v23 = vmax.f32 %v341_v17, 0.0  ;;  %v425_v17 = vadd.f32 %v1294_v6, %v1316_v22 }
  0xbf   :  { %v590_v30 = vsel %vm578_vm2, %v520_v23, 0.0 }
  0xc0   :  { %v591_v44 = vadd.f32 %v590_v30, %v589_v49 }
  0xc2   :  { %v343_v55 = vpop.f32.mrf.mxu0  ;;  %v1353_v56 = vpop.f32.mrf.mxu1 }
  0xc3   :  { %v1355_v57 = vpop.f32.mrf.mxu2  ;;  %v1371_v5 = vpop.f32.mrf.mxu3  ;;  %v344_v21 = vadd.f32 %v1294_v6, %v343_v55 }
  0xc5   :  { %v521_v25 = vmax.f32 %v344_v21, 0.0 }
  0xc7   :  { %v592_v40 = vsel %vm578_vm2, %v521_v25, 0.0 }
  0xc8   :  { %v593_v55 = vadd.f32 %v592_v40, %v591_v44  ;;  %v374_v40 = vadd.f32 %v1294_v6, %v1283_v3 }
  0xca   :  { %v346_v59 = vpop.f32.mrf.mxu0  ;;  %v1359_v60 = vpop.f32.mrf.mxu1 }
  0xcb   :  { %v1361_v61 = vpop.f32.mrf.mxu2  ;;  %v1377_v11 = vpop.f32.mrf.mxu3  ;;  %v347_v24 = vadd.f32 %v1294_v6, %v346_v59 }
  0xcd   :  { %v522_v32 = vmax.f32 %v347_v24, 0.0 }
  0xcf   :  { %v594_v46 = vsel %vm578_vm2, %v522_v32, 0.0 }
  0xd0   :  { %v595_v21 = vadd.f32 %v594_v46, %v593_v55 }
  0xd2   :  { %v349_v63 = vpop.f32.mrf.mxu0  ;;  %v1365_v0 = vpop.f32.mrf.mxu1 }
  0xd3   :  { %v1367_v1 = vpop.f32.mrf.mxu2  ;;  %v1383_v16 = vpop.f32.mrf.mxu3  ;;  %v350_v26 = vadd.f32 %v1294_v6, %v349_v63 }
  0xd5   :  { %v523_v41 = vmax.f32 %v350_v26, 0.0 }
  0xd7   :  { %v596_v59 = vsel %vm578_vm2, %v523_v41, 0.0 }
  0xd8   :  { %v597_v25 = vadd.f32 %v596_v59, %v595_v21  ;;  %v434_v59 = vadd.f32 %v1294_v6, %v1339_v45 }
  0xda   :  { %v352_v2 = vpop.f32.mrf.mxu0  ;;  %v1369_v4 = vpop.f32.mrf.mxu1 }
  0xdb   :  { %v1375_v9 = vpop.f32.mrf.mxu2  ;;  %v353_v33 = vadd.f32 %v1294_v6, %v352_v2  ;;  %v1395_v34 = vpop.f32.mrf.mxu3 }
  0xdd   :  { %v524_v48 = vmax.f32 %v353_v33, 0.0 }
  0xdf   :  { %v598_v49 = vsel %vm578_vm2, %v524_v48, 0.0 }
  0xe0   :  { %v599_v41 = vadd.f32 %v598_v49, %v597_v25 }
  0xe2   :  { %v355_v7 = vpop.f32.mrf.mxu0  ;;  %v1373_v8 = vpop.f32.mrf.mxu1 }
  0xe3   :  { %v1381_v15 = vpop.f32.mrf.mxu2  ;;  %v356_v42 = vadd.f32 %v1294_v6, %v355_v7 }
  0xe5   :  { %v525_v63 = vmax.f32 %v356_v42, 0.0  ;;  %v1420_v42 = vpop.f32.mrf.mxu3 }
  0xea   :  { %v358_v12 = vpop.f32.mrf.mxu0  ;;  %v1379_v14 = vpop.f32.mrf.mxu1 }
  0xeb   :  { %v1391_v28 = vpop.f32.mrf.mxu2  ;;  %v359_v50 = vadd.f32 %v1294_v6, %v358_v12  ;;  %v547_v12 = vmax.f32 %v422_v51, 0.0  ;;  %v549_v51 = vmax.f32 %v428_v13, 0.0  ;;  %v377_v13 = vadd.f32 %v1294_v6, %v1299_v10 }
  0xed   :  { %v526_v7 = vmax.f32 %v359_v50, 0.0  ;;  %v649_v50 = vsel %vm578_vm2, %v547_v12, 0.0  ;;  %v653_v45 = vsel %vm578_vm2, %v549_v51, 0.0 }
  0xef   :  { %v602_v44 = vsel %vm578_vm2, %v526_v7, 0.0  ;;  %v550_v7 = vmax.f32 %v431_v29, 0.0 }
  0xf1   :  { %v655_v29 = vsel %vm578_vm2, %v550_v7, 0.0 }
  0xf2   :  { %v361_v18 = vpop.f32.mrf.mxu0  ;;  %v1386_v20 = vpop.f32.mrf.mxu1 }
  0xf3   :  { %v362_v2 = vadd.f32 %v1294_v6, %v361_v18  ;;  %v1411_v24 = vpop.f32.mrf.mxu2  ;;  %v600_v18 = vsel %vm578_vm2, %v525_v63, 0.0 }
  0xf4   :  { %v601_v55 = vadd.f32 %v600_v18, %v599_v41  ;;  %v551_v18 = vmax.f32 %v434_v59, 0.0 }
  0xf5   :  { %v527_v32 = vmax.f32 %v362_v2, 0.0 }
  0xf6   :  { %v603_v21 = vadd.f32 %v602_v44, %v601_v55 }
  0xf7   :  { %v604_v3 = vsel %vm578_vm2, %v527_v32, 0.0  ;;  %v440_v32 = vadd.f32 %v1294_v6, %v1355_v57 }
  0xf8   :  { %v605_v25 = vadd.f32 %v604_v3, %v603_v21  ;;  %v446_v3 = vadd.f32 %v1294_v6, %v1367_v1 }
  0xf9   :  { %v553_v59 = vmax.f32 %v440_v32, 0.0  ;;  %v392_v32 = vadd.f32 %v1294_v6, %v1347_v52 }
  0xfa   :  { %v364_v36 = vpop.f32.mrf.mxu0  ;;  %v1397_v38 = vpop.f32.mrf.mxu1 }
  0xfb   :  { %v365_v23 = vadd.f32 %v1294_v6, %v364_v36  ;;  %v548_v36 = vmax.f32 %v425_v17, 0.0  ;;  %v531_v17 = vmax.f32 %v374_v40, 0.0  ;;  %v383_v40 = vadd.f32 %v1294_v6, %v1320_v27  ;;  %v460_v41 = vpop.f32.mrf.mxu2 }
  0xfc   :  { %v657_v27 = vsel %vm578_vm2, %v551_v18, 0.0 }
  0xfd   :  { %v528_v46 = vmax.f32 %v365_v23, 0.0  ;;  %v651_v37 = vsel %vm578_vm2, %v548_v36, 0.0  ;;  %v437_v23 = vadd.f32 %v1294_v6, %v1349_v53  ;;  %v380_v53 = vadd.f32 %v1294_v6, %v1310_v19  ;;  %v1450_v19 = vpop.f32.mrf.mxu3 }
  0xff   :  { %v606_v12 = vsel %vm578_vm2, %v528_v46, 0.0  ;;  %v552_v44 = vmax.f32 %v437_v23, 0.0  ;;  %v443_v46 = vadd.f32 %v1294_v6, %v1361_v61  ;;  %v533_v61 = vmax.f32 %v380_v53, 0.0 }
 0x100   :  { %v607_v10 = vadd.f32 %v606_v12, %v605_v25  ;;  %v449_v23 = vadd.f32 %v1294_v6, %v1375_v9 }
 0x101   :  { %v554_v7 = vmax.f32 %v443_v46, 0.0  ;;  %v616_v18 = vsel %vm578_vm2, %v533_v61, 0.0  ;;  %v395_v46 = vadd.f32 %v1294_v6, %v1353_v56 }
 0x102   :  { %v367_v26 = vpop.f32.mrf.mxu0  ;;  %v418_v30 = vpop.f32.mrf.mxu1  ;;  %v556_v53 = vmax.f32 %v449_v23, 0.0 }
 0x103   :  { %v368_v22 = vadd.f32 %v1294_v6, %v367_v26  ;;  %v419_v33 = vadd.f32 %v1294_v6, %v418_v30 }
 0x105   :  { %v546_v48 = vmax.f32 %v419_v33, 0.0  ;;  %v529_v63 = vmax.f32 %v368_v22, 0.0 }
 0x107   :  { %v648_v2 = vsel %vm578_vm2, %v546_v48, 0.0  ;;  %v608_v22 = vsel %vm578_vm2, %v529_v63, 0.0  ;;  %v532_v48 = vmax.f32 %v377_v13, 0.0  ;;  %v389_v13 = vadd.f32 %v1294_v6, %v1336_v43 }
 0x108   :  { %v650_v49 = vadd.f32 %v649_v50, %v648_v2  ;;  %v386_v50 = vadd.f32 %v1294_v6, %v1328_v35  ;;  %v609_v51 = vadd.f32 %v608_v22, %v607_v10  ;;  %v612_v2 = vsel %vm578_vm2, %v531_v17, 0.0 }
 0x109   :  { %v659_v35 = vsel %vm578_vm2, %v552_v44, 0.0  ;;  %v614_v25 = vsel %vm578_vm2, %v532_v48, 0.0  ;;  %v661_v17 = vsel %vm578_vm2, %v553_v59, 0.0  ;;  %v663_v43 = vsel %vm578_vm2, %v554_v7, 0.0  ;;  %v463_v44 = vpop.f32.mrf.mxu2 }
 0x10a   :  { %v652_v26 = vadd.f32 %v651_v37, %v650_v49  ;;  %v370_v30 = vpop.f32.mrf.mxu0  ;;  %v534_v37 = vmax.f32 %v383_v40, 0.0  ;;  %v535_v12 = vmax.f32 %v386_v50, 0.0  ;;  %v455_v40 = vadd.f32 %v1294_v6, %v1391_v28 }
 0x10b   :  { %v371_v33 = vadd.f32 %v1294_v6, %v370_v30  ;;  %v452_v30 = vadd.f32 %v1294_v6, %v1381_v15  ;;  %v458_v48 = vadd.f32 %v1294_v6, %v1411_v24  ;;  %v537_v50 = vmax.f32 %v392_v32, 0.0 }
 0x10c   :  { %v654_v36 = vadd.f32 %v653_v45, %v652_v26  ;;  %v555_v26 = vmax.f32 %v446_v3, 0.0  ;;  %v620_v10 = vsel %vm578_vm2, %v535_v12, 0.0  ;;  %v667_v59 = vsel %vm578_vm2, %v556_v53, 0.0 }
 0x10d   :  { %v530_v57 = vmax.f32 %v371_v33, 0.0  ;;  %v618_v33 = vsel %vm578_vm2, %v534_v37, 0.0  ;;  %v558_v3 = vmax.f32 %v455_v40, 0.0  ;;  %v464_v56 = vadd.f32 %v1294_v6, %v463_v44 }
 0x10e   :  { %v656_v55 = vadd.f32 %v655_v29, %v654_v36  ;;  %v536_v36 = vmax.f32 %v389_v13, 0.0  ;;  %v665_v52 = vsel %vm578_vm2, %v555_v26, 0.0  ;;  %v467_v24 = vadd.f32 %v1294_v6, %v1325_v31 }
 0x10f   :  { %v610_v63 = vsel %vm578_vm2, %v530_v57, 0.0  ;;  %v557_v57 = vmax.f32 %v452_v30, 0.0  ;;  %v624_v7 = vsel %vm578_vm2, %v537_v50, 0.0  ;;  %v404_v13 = vadd.f32 %v1294_v6, %v1369_v4 }
 0x110   :  { %v658_v21 = vadd.f32 %v657_v27, %v656_v55  ;;  %v611_v49 = vadd.f32 %v610_v63, %v609_v51  ;;  %v398_v51 = vadd.f32 %v1294_v6, %v1359_v60  ;;  %v1481_v27 = vpop.f32.mrf.mxu3  ;;  %v461_v63 = vadd.f32 %v1294_v6, %v460_v41 }
 0x111   :  { %v401_v60 = vadd.f32 %v1294_v6, %v1365_v0  ;;  %v669_v37 = vsel %vm578_vm2, %v557_v57, 0.0  ;;  %v407_v32 = vadd.f32 %v1294_v6, %v1373_v8  ;;  %v541_v53 = vmax.f32 %v404_v13, 0.0 }
 0x112   :  { %v660_v45 = vadd.f32 %v659_v35, %v658_v21  ;;  %v613_v1 = vadd.f32 %v612_v2, %v611_v49  ;;  %v622_v2 = vsel %vm578_vm2, %v536_v36, 0.0  ;;  %v538_v49 = vmax.f32 %v395_v46, 0.0 }
 0x113   :  { %v559_v35 = vmax.f32 %v458_v48, 0.0  ;;  %v539_v23 = vmax.f32 %v398_v51, 0.0  ;;  %v560_v31 = vmax.f32 %v461_v63, 0.0  ;;  %v542_v46 = vmax.f32 %v407_v32, 0.0 }
 0x114   :  { %v662_v9 = vadd.f32 %v661_v17, %v660_v45  ;;  %v615_v22 = vadd.f32 %v614_v25, %v613_v1  ;;  %v671_v45 = vsel %vm578_vm2, %v558_v3, 0.0  ;;  %v561_v1 = vmax.f32 %v464_v56, 0.0 }
 0x115   :  { %v562_v25 = vmax.f32 %v467_v24, 0.0  ;;  %v470_v17 = vadd.f32 %v1294_v6, %v1333_v39  ;;  %v626_v30 = vsel %vm578_vm2, %v538_v49, 0.0  ;;  %v628_v4 = vsel %vm578_vm2, %v539_v23, 0.0 }
 0x116   :  { %v664_v29 = vadd.f32 %v663_v43, %v662_v9  ;;  %v617_v15 = vadd.f32 %v616_v18, %v615_v22  ;;  %v540_v18 = vmax.f32 %v401_v60, 0.0  ;;  %v673_v9 = vsel %vm578_vm2, %v559_v35, 0.0 }
 0x117   :  { %v473_v22 = vadd.f32 %v1294_v6, %v1341_v47  ;;  %v410_v39 = vadd.f32 %v1294_v6, %v1379_v14  ;;  %v675_v40 = vsel %vm578_vm2, %v560_v31, 0.0  ;;  %v563_v36 = vmax.f32 %v470_v17, 0.0 }
 0x118   :  { %v666_v28 = vadd.f32 %v665_v52, %v664_v29  ;;  %v619_v55 = vadd.f32 %v618_v33, %v617_v15  ;;  %v1509_v15 = vpop.f32.mrf.mxu3  ;;  %v630_v44 = vsel %vm578_vm2, %v540_v18, 0.0  ;;  %v476_v47 = vadd.f32 %v1294_v6, %v1351_v54 }
 0x119   :  { %v413_v52 = vadd.f32 %v1294_v6, %v1386_v20  ;;  %v679_v14 = vsel %vm578_vm2, %v562_v25, 0.0  ;;  %v564_v57 = vmax.f32 %v473_v22, 0.0  ;;  %v632_v51 = vsel %vm578_vm2, %v541_v53, 0.0 }
 0x11a   :  { %v668_v61 = vadd.f32 %v667_v59, %v666_v28  ;;  %v621_v21 = vadd.f32 %v620_v10, %v619_v55  ;;  %v677_v10 = vsel %vm578_vm2, %v561_v1, 0.0  ;;  %v479_v28 = vadd.f32 %v1294_v6, %v1357_v58 }
 0x11b   :  { %v543_v55 = vmax.f32 %v410_v39, 0.0  ;;  %v416_v59 = vadd.f32 %v1294_v6, %v1397_v38  ;;  %v681_v54 = vsel %vm578_vm2, %v563_v36, 0.0  ;;  %v565_v56 = vmax.f32 %v476_v47, 0.0  ;;  %v754_v36 = vld [vmem:[%s1592_s5 + $0x18] sm:$0xff] }
 0x11c   :  { %v670_v41 = vadd.f32 %v669_v37, %v668_v61  ;;  %v623_v12 = vadd.f32 %v622_v2, %v621_v21  ;;  %v634_v20 = vsel %vm578_vm2, %v542_v46, 0.0  ;;  %v482_v2 = vadd.f32 %v1294_v6, %v1363_v62  ;;  %775 = vmatpush.msrb.mxu2 %v754_v36 }
 0x11d   :  { %v544_v24 = vmax.f32 %v413_v52, 0.0  ;;  %v683_v61 = vsel %vm578_vm2, %v564_v57, 0.0  ;;  %v566_v58 = vmax.f32 %v479_v28, 0.0  ;;  %v636_v60 = vsel %vm578_vm2, %v543_v55, 0.0 }
 0x11e   :  { %v672_v0 = vadd.f32 %v671_v45, %v670_v41  ;;  %v625_v26 = vadd.f32 %v624_v7, %v623_v12  ;;  %v485_v38 = vadd.f32 %v1294_v6, %v1371_v5  ;;  %v545_v37 = vmax.f32 %v416_v59, 0.0 }
 0x11f   :  { %v685_v23 = vsel %vm578_vm2, %v565_v56, 0.0  ;;  %v567_v41 = vmax.f32 %v482_v2, 0.0  ;;  %v638_v12 = vsel %vm578_vm2, %v544_v24, 0.0  ;;  %v488_v62 = vadd.f32 %v1294_v6, %v1377_v11 }
 0x120   :  { %v627_v33 = vadd.f32 %v626_v30, %v625_v26  ;;  %v674_v43 = vadd.f32 %v673_v9, %v672_v0  ;;  %v508_v45 = vpop.f32.mrf.mxu3  ;;  %v687_v1 = vsel %vm578_vm2, %v566_v58, 0.0  ;;  %v568_v25 = vmax.f32 %v485_v38, 0.0 }
 0x121   :  { %v640_v17 = vsel %vm578_vm2, %v545_v37, 0.0  ;;  %v491_v5 = vadd.f32 %v1294_v6, %v1383_v16  ;;  %v689_v30 = vsel %vm578_vm2, %v567_v41, 0.0  ;;  %v569_v18 = vmax.f32 %v488_v62, 0.0 }
 0x122   :  { %v629_v29 = vadd.f32 %v628_v4, %v627_v33  ;;  %v676_v8 = vadd.f32 %v675_v40, %v674_v43  ;;  %v494_v32 = vadd.f32 %v1294_v6, %v1395_v34  ;;  %v691_v9 = vsel %vm578_vm2, %v568_v25, 0.0  ;;  %v940_v25 = vld [vmem:[%s1591_s4] ss:$0 sm:$0xff]  ;;  %s974_s4 = smov [#allocation3]  }
 0x123   :  { %v570_v4 = vmax.f32 %v491_v5, 0.0  ;;  %v497_v22 = vadd.f32 %v1294_v6, %v1420_v42  ;;  %v693_v43 = vsel %vm578_vm2, %v569_v18, 0.0  ;;  %v500_v16 = vadd.f32 %v1294_v6, %v1450_v19  ;;  %v753_v42 = vld [vmem:[%s1592_s5 + $0x10] sm:$0xff] }
 0x124   :  { %v631_v48 = vadd.f32 %v630_v44, %v629_v29  ;;  %v678_v50 = vadd.f32 %v677_v10, %v676_v8  ;;  %v571_v53 = vmax.f32 %v494_v32, 0.0  ;;  %v503_v34 = vadd.f32 %v1294_v6, %v1481_v27  ;;  %v752_v27 = vld [vmem:[%s1592_s5 + $0x8] sm:$0xff]  ;;  %776 = vmatpush.msrb.mxu2 %v753_v42  ;;  %v942_v32 = vld [vmem:[#allocation2] ss:$0 sm:$0xff] }
 0x125   :  { %v695_v40 = vsel %vm578_vm2, %v570_v4, 0.0  ;;  %v572_v10 = vmax.f32 %v497_v22, 0.0  ;;  %v573_v44 = vmax.f32 %v500_v16, 0.0  ;;  %v506_v47 = vadd.f32 %v1294_v6, %v1509_v15 }
 0x126   :  { %v680_v3 = vadd.f32 %v679_v14, %v678_v50  ;;  %v633_v63 = vadd.f32 %v632_v51, %v631_v48  ;;  %v697_v19 = vsel %vm578_vm2, %v571_v53, 0.0  ;;  %v574_v14 = vmax.f32 %v503_v34, 0.0  ;;  %v751_v50 = vld [vmem:[%s1592_s5] sm:$0xff]  ;;  %777 = vmatpush.msrb.mxu2 %v752_v27 }
 0x127   :  { %v699_v52 = vsel %vm578_vm2, %v572_v10, 0.0  ;;  %v509_v57 = vadd.f32 %v1294_v6, %v508_v45  ;;  %v701_v15 = vsel %vm578_vm2, %v573_v44, 0.0  ;;  %v575_v55 = vmax.f32 %v506_v47, 0.0 }
 0x128   :  { %v682_v21 = vadd.f32 %v681_v54, %v680_v3  ;;  %v635_v49 = vadd.f32 %v634_v20, %v633_v63  ;;  %v511_v8 = vpop.f32.mrf.mxu3  ;;  %778 = vmatpush.msrb.mxu2 %v751_v50  ;;  %v703_v54 = vsel %vm578_vm2, %v574_v14, 0.0 }
 0x129   :  { %v512_v48 = vadd.f32 %v1294_v6, %v511_v8  ;;  %v576_v3 = vmax.f32 %v509_v57, 0.0  ;;  %v705_v6 = vsel %vm578_vm2, %v575_v55, 0.0 }
 0x12a   :  { %v684_v35 = vadd.f32 %v683_v61, %v682_v21  ;;  %v637_v7 = vadd.f32 %v636_v60, %v635_v49 }
 0x12b   :  { %v577_v63 = vmax.f32 %v512_v48, 0.0  ;;  %v707_v24 = vsel %vm578_vm2, %v576_v3, 0.0 }
 0x12c   :  { %v686_v13 = vadd.f32 %v685_v23, %v684_v35  ;;  %v639_v31 = vadd.f32 %v638_v12, %v637_v7 }
 0x12d   :  { %v709_v61 = vsel %vm578_vm2, %v577_v63, 0.0 }
 0x12e   :  { %v688_v0 = vadd.f32 %v687_v1, %v686_v13  ;;  %v641_v26 = vadd.f32 %v640_v17, %v639_v31  ;;  %v783_v1 = vld [vmem:[%s1594_s7] sm:$0xff] }
 0x12f   :  { %806 = vmatpush.msrb.mxu3 %v783_v1 }
 0x130   :  { %v690_v11 = vadd.f32 %v689_v30, %v688_v0  ;;  %v642_v28 = vrot.slane %v641_v26, 4 }
 0x132   :  { %v692_v33 = vadd.f32 %v691_v9, %v690_v11  ;;  %v643_v20 = vadd.f32 %v642_v28, %v641_v26  ;;  %v941_v26 = vld [vmem:[%s1593_s6] ss:$0 sm:$0xff]  ;;  %s842_s6 = sshll.u32 %s974_s4, 4  ;;  %s843_s6 = int_to_ptr.vmem [resolvable:$true] %s842_s6 }
 0x134   :  { %v694_v39 = vadd.f32 %v693_v43, %v692_v33  ;;  %v644_v49 = vrot.slane %v643_v20, 2 }
 0x136   :  { %v696_v29 = vadd.f32 %v695_v40, %v694_v39  ;;  %v645_v38 = vadd.f32 %v644_v49, %v643_v20 }
 0x138   :  { %v698_v46 = vadd.f32 %v697_v19, %v696_v29  ;;  %v646_v7 = vrot.slane %v645_v38, 1 }
 0x13a   :  { %v700_v51 = vadd.f32 %v699_v52, %v698_v46  ;;  %v647_v12 = vadd.f32 %v646_v7, %v645_v38 }
 0x13c   :  { %v702_v59 = vadd.f32 %v701_v15, %v700_v51  ;;  %v717_v13 = vmul.f32 0.00390625, %v647_v12 }
 0x13e   :  { %v704_v56 = vadd.f32 %v703_v54, %v702_v59 }
 0x140   :  { %v706_v2 = vadd.f32 %v705_v6, %v704_v56 }
 0x142   :  { %v708_v21 = vadd.f32 %v707_v24, %v706_v2 }
 0x144   :  { %v710_v58 = vadd.f32 %v709_v61, %v708_v21 }
 0x146   :  { %v711_v60 = vrot.slane %v710_v58, 4 }
 0x148   :  { %v712_v37 = vadd.f32 %v711_v60, %v710_v58 }
 0x14a   :  { %v713_v35 = vrot.slane %v712_v37, 2 }
 0x14c   :  { %v714_v23 = vadd.f32 %v713_v35, %v712_v37 }
 0x14e   :  { %v715_v41 = vrot.slane %v714_v23, 1 }
 0x150   :  { %v716_v62 = vadd.f32 %v715_v41, %v714_v23 }
 0x152   :  { %v718_v45 = vmul.f32 0.00390625, %v716_v62 }
 0x154   :  { %v727_v31 = vsel %vm726_vm3, %v718_v45, %v717_v13 }
 0x155   :  { %918 = vmatmul.msk.f32.vlgmr.msrb.gmra.mxu1 %vm578_vm2, %v727_v31 }
 0x1d2   :  { %v747_v17 = vpop.f32.mrf.mxu1 }
 0x1d3   :  { %v748_v5 = vadd.f32 %v940_v25, %v747_v17 }
 0x1d5   :  { %v750_v0 = vmax.f32 %v748_v5, 0.0 }
 0x1d7   :  { %919 = vmatmul.msk.f32.vlgmr.msrb.gmra.mxu2 %vm759_vm4, %v750_v0 }
 0x25a   :  { %v780_v30 = vpop.f32.mrf.mxu2 }
 0x25b   :  { %v781_v18 = vadd.f32 %v941_v26, %v780_v30 }
 0x25d   :  { %920 = vmatmul.msk.f32.vlgmr.msrb.gmra.mxu3 %vm578_vm2, %v781_v18  ;;  %832 = vrot.lane.b32.xlu0 %v781_v18, %s973_s24 }
 0x2cf   :  { %v833_v8 = vpop.permute.xlu0 %832 }
 0x2e0   :  { %v808_v11 = vpop.f32.mrf.mxu3 }
 0x2e1   :  { %v809_v9 = vadd.f32 %v942_v32, %v808_v11 }
 0x2e3   :  { %v921_v4 = vmul.f32 -1.442695, %v809_v9 }
 0x2e5   :  { %943 = vpow2.f32 %v921_v4 }
 0x2eb   :  { %v944_v22 = vpop.eup %943 }
 0x2ec   :  { %v814_v33 = vadd.f32 1.0, %v944_v22 }
 0x2ee   :  { %945 = vrcp.f32 %v814_v33  ;;  %v826_v39 = vand.u32 2147483648, %v814_v33  ;;  %v824_v10 = vand.u32 2147483647, %v814_v33  ;;  %vm820_vm6 = vweird.f32 %v814_v33 }
 0x2f0   :  { %v827_v36 = vor.u32 1.1754944e-38, %v826_v39  ;;  %vm825_vm9 = vcmp.eq.f32.partialorder %v824_v10, 8.507059e+37 }
 0x2f4   :  { %v946_v43 = vpop.eup %945 }
 0x2f5   :  { %v816_v53 = vmul.f32 %v946_v43, %v814_v33  ;;  %vm821_vm5 = vweird.f32 %v946_v43 }
 0x2f6   :  { %vm822_vm7 = vmor %vm820_vm6, %vm821_vm5 }
 0x2f7   :  { %v817_v16 = vsub.f32 1.0, %v816_v53 }
 0x2f9   :  { %v818_v40 = vmul.f32 %v946_v43, %v817_v16 }
 0x2fb   :  { %v819_v34 = vadd.f32 %v946_v43, %v818_v40 }
 0x2fd   :  { %v823_v42 = vsel %vm822_vm7, %v946_v43, %v819_v34 }
 0x2fe   :  { %v828_v29 = vsel %vm825_vm9, %v827_v36, %v823_v42 }
 0x2ff   :  { %831 = vst.msk [vmem:[#allocation3] sm:$0x3] %vm830_vm8, %v828_v29 }
 0x300   :  { %836 = vst.msk [vmem:[#allocation3] sm:$0x3] %vm835_vm10, %v833_v8 }
 0x301   :  { %847 = dma.vmem_to_hbm [thread:$0]  %s843_s6, 32, %s845_s25, [#allocation4]  }
 0x302   :  { %971 = dma.done.wait [#allocation4], 32  }
 0x303   :  { %972 = vsyncadd [#allocation4], 4294967264 }
 0x304   :  { %852 = vsyncpa [#allocation4], 1 }

</bundles_post_ra>
